<compile_context>
chip_gen: v7x
topology: tpu7x:2x2x1
jax: 0.10.0
libtpu: 0.0.40
codegen_flags: <defaults>
</compile_context>

<pallas_src>
import numpy as np
import jax
import jax.numpy as jnp
from jax import lax
from jax.experimental import pallas as pl
from jax.experimental.pallas import tpu as pltpu


# ----------------------------------------------------------------------------
# STFT basis construction (matches tacotron2/waveglow stft.py semantics)
# ----------------------------------------------------------------------------
def _hann_periodic(win_length):
    n = np.arange(win_length)
    return 0.5 - 0.5 * np.cos(2.0 * np.pi * n / win_length)   # scipy 'hann', fftbins=True


def _round_up(x, m):
    return ((x + m - 1) // m) * m


def make_stft_bases(filter_length, hop_length, win_length):
    """Builds lane-dense packed STFT bases (spectrum packed to exactly F lanes).

    Returns:
      fwd_packed : (F, F) f32   frames @ fwd_packed -> packed spectrum
      inv_packed : (F, F) f32   packed (denoised) spectrum @ inv_packed -> frame
                                (the F/hop output scale is already folded in)
      win_full   : (F,)   f32   padded analysis window (for window_sumsquare)
    """
    f = filter_length
    assert f % 256 == 0, "filter_length must be a multiple of 256 for lane-aligned packing"
    cutoff = f // 2 + 1
    h = f // 2
    fourier = np.fft.fft(np.eye(f))
    fb = np.vstack([np.real(fourier[:cutoff]), np.imag(fourier[:cutoff])])   # (2C, F)
    scale = f / hop_length
    inv = np.linalg.pinv(scale * fb).T                                       # (2C, F)
    assert f >= win_length
    win = _hann_periodic(win_length)
    pad = (f - win_length) // 2                                              # pad_center
    win_full = np.zeros(f)
    win_full[pad:pad + win_length] = win
    fwd = fb * win_full[None, :]                                             # (2C, F)
    invb = inv * win_full[None, :]                                           # (2C, F)

    # Packed component order: [real 0..h-1 | real h (Nyquist), imag 1..h-1].
    # The dropped imag(0)/imag(h) rows are identically ~0 for real input.
    order = np.concatenate([np.arange(0, h),
                            np.array([h]),
                            cutoff + np.arange(1, h)])                       # len == F
    fwd_packed = np.ascontiguousarray(fwd[order].T).astype(np.float32)       # (F, F)
    inv_packed = (invb[order] * scale).astype(np.float32)                    # (F, F), fold F/hop
    return fwd_packed, inv_packed, win_full.astype(np.float32)


def window_sumsquare(win_full, n_frames, hop_length, n_fft):
    win_sq = (win_full.astype(np.float64) ** 2)
    n = n_fft + hop_length * (n_frames - 1)
    x = np.zeros(n, dtype=np.float32)
    for i in range(n_frames):
        s = i * hop_length
        x[s:min(n, s + n_fft)] += win_sq[: max(0, min(n_fft, n - s))].astype(np.float32)
    return x


# ----------------------------------------------------------------------------
# Pallas kernels
# ----------------------------------------------------------------------------
def _packed_mags(spec):
    """Per-component magnitudes for the packed spectrum (tn, F) -> two (tn, F/2)."""
    h = spec.shape[-1] // 2
    a = spec[:, :h]                     # real bins 0..h-1
    b = spec[:, h:]                     # [real h (Nyquist), imag 1..h-1]
    col0 = lax.broadcasted_iota(jnp.int32, (1, h), 1) == 0
    # In column 0 the two halves are two INDEPENDENT real-only bins (DC, Nyquist);
    # everywhere else they are the (real, imag) pair of the same bin.
    b_cross = jnp.where(col0, 0.0, b)
    a_cross = jnp.where(col0, 0.0, a)
    mag_a = jnp.sqrt(a * a + b_cross * b_cross)
    mag_b = jnp.sqrt(a_cross * a_cross + b * b)
    return a, b, mag_a, mag_b


def _mag_kernel(frames_ref,      # (TN, F)  bf16 analysis frames
                fwd_ref,         # (F, F)   bf16 forward basis (packed)
                mag_ref):        # (TN, F)  f32  packed per-component magnitudes
    spec = jnp.dot(frames_ref[...], fwd_ref[...], preferred_element_type=jnp.float32)
    _, _, mag_a, mag_b = _packed_mags(spec)
    mag_ref[...] = jnp.concatenate([mag_a, mag_b], axis=-1)


def _denoise_kernel(strength_ref,     # SMEM (1,) f32
                    frames_ref,       # (TN, F)  bf16 analysis frames
                    fwd_ref,          # (F, F)   bf16 forward basis (packed)
                    inv_ref,          # (F, F)   bf16 inverse basis (packed, F/hop folded)
                    bias_ref,         # (1, F)   f32  packed bias magnitudes
                    frame_out_ref):   # (TN, F)  bf16 per-frame inverse (pre overlap-add)
    h = fwd_ref.shape[1] // 2
    strength = strength_ref[0]
    # forward transform: one MXU matmul producing the packed spectrum
    spec = jnp.dot(frames_ref[...], fwd_ref[...], preferred_element_type=jnp.float32)
    a, b, mag_a, mag_b = _packed_mags(spec)
    bias_a = bias_ref[:, :h]
    bias_b = bias_ref[:, h:]
    # denoise: clamp(mag - bias * strength, 0), then rescale components by den/mag.
    # (strength >= 0 guarantees den == 0 wherever mag ~ 0, so the guarded
    #  approximate reciprocal never leaks; eps guard avoids denormal -> inf.)
    den_a = jnp.maximum(mag_a - bias_a * strength, 0.0)
    den_b = jnp.maximum(mag_b - bias_b * strength, 0.0)
    scale_a = den_a * pl.reciprocal(jnp.maximum(mag_a, 1e-20), approx=True)
    scale_b = den_b * pl.reciprocal(jnp.maximum(mag_b, 1e-20), approx=True)
    scaled = jnp.concatenate([(a * scale_a).astype(jnp.bfloat16),
                              (b * scale_b).astype(jnp.bfloat16)], axis=-1)
    # inverse transform: one MXU matmul; bf16 writeback (f32 accumulation upstream).
    frame_out_ref[...] = jnp.dot(scaled, inv_ref[...],
                                 preferred_element_type=jnp.float32
                                 ).astype(frame_out_ref.dtype)


# ----------------------------------------------------------------------------
# pallas_call wrappers
# ----------------------------------------------------------------------------
def _choose_tile_n(n, f, tile_n=None):
    if tile_n is None:
        tile_n = 512 if f <= 1024 else 256
    # bf16 tiles: keep the sublane dim a multiple of 16; don't over-pad tiny N.
    return min(tile_n, max(16, _round_up(n, 16)))


def _vmem_limit_bytes(tn, f):
    need = (2 * tn * f * 2        # frames (bf16), double-buffered
            + 2 * tn * f * 2      # frame_out (bf16), double-buffered
            + 2 * f * f * 2       # fwd + inv bases (bf16), single-buffered
            + f * 4               # bias spectrum
            + 6 * tn * f * 4)     # f32 spec/mag/scale intermediates + spill headroom
    try:
        cap = pltpu.get_tpu_info().vmem_capacity_bytes - (8 << 20)
    except Exception:             # not on a TPU / old API: assume the smallest part (v7x)
        cap = 56 << 20
    return int(max(32 << 20, min(2 * need, cap)))


def _resident_spec(block_shape, index_map, buffered):
    # Constant-index-map operands stay resident across the grid; request
    # single buffering so they don't burn 2x VMEM (matters on v7x's 64 MiB).
    if buffered:
        return pl.BlockSpec(block_shape, index_map, pipeline_mode=pl.Buffered(1))
    return pl.BlockSpec(block_shape, index_map)


def stft_magnitude(frames, fwd_packed, tile_n=None):
    """frames (N, F) f32 -> packed |STFT| (N, F) f32.  Used once for the bias spectrum."""
    n, f = frames.shape
    tn = _choose_tile_n(n, f, tile_n)
    n_pad = pl.cdiv(n, tn) * tn
    frames_p = jnp.pad(frames, ((0, n_pad - n), (0, 0))).astype(jnp.bfloat16)

    def call(buffered):
        return pl.pallas_call(
            _mag_kernel,
            out_shape=jax.ShapeDtypeStruct((n_pad, f), jnp.float32),
            grid_spec=pltpu.PrefetchScalarGridSpec(
                num_scalar_prefetch=0,
                grid=(n_pad // tn,),
                in_specs=[
                    pl.BlockSpec((tn, f), lambda i: (i, 0)),          # frames
                    _resident_spec((f, f), lambda i: (0, 0), buffered),  # fwd basis
                ],
                out_specs=pl.BlockSpec((tn, f), lambda i: (i, 0)),
            ),
            compiler_params=pltpu.CompilerParams(
                dimension_semantics=("parallel",),
                vmem_limit_bytes=_vmem_limit_bytes(tn, f)),
        )(frames_p, fwd_packed)

    try:
        mag = call(True)
    except Exception:   # pl.Buffered(1) not supported by this jax/libtpu build
        mag = call(False)
    return mag[:n]


def spectral_denoise(frames, fwd_packed, inv_packed, bias_spec, strength, tile_n=None):
    """frames (N, F) f32 -> denoised per-frame inverse transform (N, F) bf16."""
    n, f = frames.shape
    tn = _choose_tile_n(n, f, tile_n)
    n_pad = pl.cdiv(n, tn) * tn
    frames_p = jnp.pad(frames, ((0, n_pad - n), (0, 0))).astype(jnp.bfloat16)
    strength_arr = jnp.asarray([strength], jnp.float32)

    def call(buffered):
        return pl.pallas_call(
            _denoise_kernel,
            out_shape=jax.ShapeDtypeStruct((n_pad, f), jnp.bfloat16),
            grid_spec=pltpu.PrefetchScalarGridSpec(
                num_scalar_prefetch=0,
                grid=(n_pad // tn,),
                in_specs=[
                    pl.BlockSpec(memory_space=pltpu.MemorySpace.SMEM),    # strength
                    pl.BlockSpec((tn, f), lambda i: (i, 0)),              # frames
                    _resident_spec((f, f), lambda i: (0, 0), buffered),   # fwd basis
                    _resident_spec((f, f), lambda i: (0, 0), buffered),   # inv basis
                    _resident_spec((1, f), lambda i: (0, 0), buffered),   # bias spectrum
                ],
                out_specs=pl.BlockSpec((tn, f), lambda i: (i, 0)),
            ),
            compiler_params=pltpu.CompilerParams(
                dimension_semantics=("parallel",),
                vmem_limit_bytes=_vmem_limit_bytes(tn, f)),
        )(strength_arr, frames_p, fwd_packed, inv_packed, bias_spec)

    try:
        frame_out = call(True)
    except Exception:   # pl.Buffered(1) not supported by this jax/libtpu build
        frame_out = call(False)
    return frame_out[:n]


# ----------------------------------------------------------------------------
# JAX glue: framing, overlap-add, window-sum compensation
# ----------------------------------------------------------------------------
def frame_signal(audio, filter_length, hop_length):
    # TODO(synk): gather frames inside the kernel via hop-strided DMA
    # (memory_space=pl.ANY + make_async_copy on the (n_chunks, hop) slab) to
    # avoid materializing the n_overlap-times duplicated frames array in HBM.
    pad = filter_length // 2
    padded = jnp.pad(audio, ((0, 0), (pad, pad)), mode="reflect")   # == torch reflect pad
    n_frames = (padded.shape[1] - filter_length) // hop_length + 1
    idx = (jnp.arange(n_frames)[:, None] * hop_length
           + jnp.arange(filter_length)[None, :])
    return padded[:, idx], n_frames            # (B, T, F)


class DenoiserPallas:
    """WaveGlow denoiser forward pass, spectral hot path in Pallas."""

    def __init__(self, hifigan_fn, filter_length=1024, n_overlap=4,
                 win_length=1024, mode="zeros", tile_n=None):
        self.filter_length = filter_length
        self.hop_length = int(filter_length / n_overlap)
        self.win_length = win_length
        self.tile_n = tile_n
        fwd_packed, inv_packed, win_full = make_stft_bases(
            filter_length, self.hop_length, win_length)
        # bf16 bases: native MXU rate with f32 accumulation, half the VMEM.
        # (Frames also travel as bf16; switch both to f32 if bit-level parity
        #  with the torch f32 reference is required.)
        self.fwd_packed = jnp.asarray(fwd_packed, jnp.bfloat16)    # (F, F)
        self.inv_packed = jnp.asarray(inv_packed, jnp.bfloat16)    # (F, F)
        self.win_full = win_full

        if mode == "zeros":
            mel_input = jnp.zeros((1, 80, 88), jnp.float32)
        elif mode == "normal":
            mel_input = jax.random.normal(jax.random.PRNGKey(1), (1, 80, 88))
        else:
            raise Exception("Mode {} if not supported".format(mode))

        bias_audio = hifigan_fn(mel_input).reshape(1, -1).astype(jnp.float32)
        frames, t = frame_signal(bias_audio, self.filter_length, self.hop_length)
        frames = frames.reshape(t, self.filter_length)                 # batch == 1
        # torch keeps only bias_spec[:, :, 0]; compute just frame 0's magnitudes.
        bias_mag = stft_magnitude(frames[:1], self.fwd_packed, tile_n=self.tile_n)
        self.bias_spec = bias_mag[0][None, :]                          # (1, F) packed

    def __call__(self, audio, strength=0.1):
        # torch clamps (mag - bias*strength) at 0; our zero-magnitude handling
        # matches torch only for strength >= 0.
        assert strength >= 0.0
        audio = audio.astype(jnp.float32)
        b, _ = audio.shape
        frames, t = frame_signal(audio, self.filter_length, self.hop_length)
        frames = frames.reshape(b * t, self.filter_length)

        frame_out = spectral_denoise(frames, self.fwd_packed, self.inv_packed,
                                     self.bias_spec, float(strength),
                                     tile_n=self.tile_n)

        # overlap-add (== conv_transpose1d with stride hop, F = n_ov * hop);
        # bf16 frame_out accumulated in f32.
        n_ov = self.filter_length // self.hop_length
        fo = frame_out.reshape(b, t, n_ov, self.hop_length).astype(jnp.float32)
        n_chunks = t + n_ov - 1
        out = jnp.zeros((b, n_chunks, self.hop_length), jnp.float32)
        for j in range(n_ov):
            out = out.at[:, j:j + t, :].add(fo[:, :, j, :])
        out = out.reshape(b, n_chunks * self.hop_length)

        # window-sum compensation + trim (as in STFT.inverse); the F/hop scale
        # is already folded into inv_packed.
        wsum = jnp.asarray(window_sumsquare(
            self.win_full, t, self.hop_length, self.filter_length))
        tiny = np.finfo(np.float32).tiny
        out = jnp.where(wsum > tiny, out / wsum, out)
        half = self.filter_length // 2
        out = out[:, half:-half]
        return out[:, None, :]           # (B, 1, num_samples), matches torch output


# ----------------------------------------------------------------------------
# Deterministic stand-in for the HiFi-GAN generator
# ----------------------------------------------------------------------------
def fake_hifigan(mel):
    # TODO(synk): the real HiFi-GAN generator architecture is not given in the
    # module; use a deterministic synthetic generator (linear upsample + tanh)
    # so bias_spec is well-defined and nonzero (as bias terms would make it).
    b, n_mel, t = mel.shape
    upsample = 64
    key = jax.random.PRNGKey(42)
    w = jax.random.normal(key, (n_mel, upsample), jnp.float32) * 0.01
    bias = jax.random.normal(jax.random.fold_in(key, 1), (upsample,), jnp.float32) * 0.1
    y = jnp.einsum("bmt,mu->btu", mel, w) + bias[None, None, :]
    return jnp.tanh(y).reshape(b, 1, t * upsample)


# ----------------------------------------------------------------------------
if __name__ == "__main__":
    # Small shapes: filter_length=256 (hop=64), batch=2, 2048 audio samples.
    filter_length = 256
    n_overlap = 4
    denoiser = DenoiserPallas(fake_hifigan,
                              filter_length=filter_length,
                              n_overlap=n_overlap,
                              win_length=filter_length,
                              mode="zeros")

    key = jax.random.PRNGKey(0)
    audio = jax.random.normal(key, (2, 2048), jnp.float32)

    audio_denoised = denoiser(audio, strength=0.1)
    audio_denoised = jax.block_until_ready(audio_denoised)

    assert audio_denoised.shape == (2, 1, 2048), audio_denoised.shape
    assert bool(jnp.all(jnp.isfinite(audio_denoised)))
    print("KERNEL_OK")
</pallas_src>

<mosaic_0001>
module attributes {stable_mosaic.version = 11 : i64} {
  func.func @_mag_kernel(%arg0: i32, %arg1: memref<16x256xbf16, #tpu.memory_space<vmem>>, %arg2: memref<256x256xbf16, #tpu.memory_space<vmem>>, %arg3: memref<16x256xf32, #tpu.memory_space<vmem>>) attributes {dimension_semantics = [#tpu.dimension_semantics<parallel>], iteration_bounds = array<i64: 1>, scalar_prefetch = 0 : i64, scratch_operands = 0 : i64, tpu.core_type = #tpu.core_type<tc>, window_params = [{transform_indices = @transform_0, window_bounds = array<i64: 16, 256>}, {pipeline_mode = #tpu.pipeline_mode<synchronous>, transform_indices = @transform_1, window_bounds = array<i64: 256, 256>}, {transform_indices = @transform_2, window_bounds = array<i64: 16, 256>}]} {
    %c0 = arith.constant 0 : index
    %c0_0 = arith.constant 0 : index
    %0 = vector.load %arg1[%c0, %c0_0] : memref<16x256xbf16, #tpu.memory_space<vmem>>, vector<16x256xbf16>
    %c0_1 = arith.constant 0 : index
    %c0_2 = arith.constant 0 : index
    %1 = vector.load %arg2[%c0_1, %c0_2] : memref<256x256xbf16, #tpu.memory_space<vmem>>, vector<256x256xbf16>
    %cst = arith.constant dense<0.000000e+00> : vector<16x256xf32>
    %2 = tpu.matmul %0, %1, %cst {dimension_numbers = #tpu.dot_dimension_numbers<[1], [0], [0], [1], [0, 0, 1, 1], [], []>} : vector<16x256xbf16>, vector<256x256xbf16>, vector<16x256xf32> -> vector<16x256xf32>
    %3 = vector.extract_strided_slice %2 {offsets = [0, 0], sizes = [16, 128], strides = [1, 1]} : vector<16x256xf32> to vector<16x128xf32>
    %4 = vector.extract_strided_slice %2 {offsets = [0, 128], sizes = [16, 128], strides = [1, 1]} : vector<16x256xf32> to vector<16x128xf32>
    %5 = tpu.iota {dimensions = array<i32: 1>} : vector<1x128xi32>
    %c0_i32 = arith.constant 0 : i32
    %6 = vector.broadcast %c0_i32 : i32 to vector<1x128xi32>
    %7 = arith.cmpi eq, %5, %6 : vector<1x128xi32>
    %cst_3 = arith.constant 0.000000e+00 : f32
    %8 = vector.shape_cast %7 : vector<1x128xi1> to vector<1x128xi1>
    %9 = vector.broadcast %8 : vector<1x128xi1> to vector<16x128xi1>
    %10 = vector.broadcast %cst_3 : f32 to vector<16x128xf32>
    %11 = arith.select %9, %10, %4 : vector<16x128xi1>, vector<16x128xf32>
    %cst_4 = arith.constant 0.000000e+00 : f32
    %12 = vector.shape_cast %7 : vector<1x128xi1> to vector<1x128xi1>
    %13 = vector.broadcast %12 : vector<1x128xi1> to vector<16x128xi1>
    %14 = vector.broadcast %cst_4 : f32 to vector<16x128xf32>
    %15 = arith.select %13, %14, %3 : vector<16x128xi1>, vector<16x128xf32>
    %16 = arith.mulf %3, %3 : vector<16x128xf32>
    %17 = arith.mulf %11, %11 : vector<16x128xf32>
    %18 = arith.addf %16, %17 : vector<16x128xf32>
    %19 = math.sqrt %18 : vector<16x128xf32>
    %20 = arith.mulf %15, %15 : vector<16x128xf32>
    %21 = arith.mulf %4, %4 : vector<16x128xf32>
    %22 = arith.addf %20, %21 : vector<16x128xf32>
    %23 = math.sqrt %22 : vector<16x128xf32>
    %24 = tpu.concatenate %19, %23 in 1 : vector<16x128xf32>, vector<16x128xf32> -> vector<16x256xf32>
    %c0_5 = arith.constant 0 : index
    %c0_6 = arith.constant 0 : index
    %25 = vector.load %arg3[%c0_5, %c0_6] : memref<16x256xf32, #tpu.memory_space<vmem>>, vector<16x256xf32>
    tpu.vector_store %arg3[%c0_5, %c0_6], %24 {strides = array<i32>} : memref<16x256xf32, #tpu.memory_space<vmem>>, vector<16x256xf32>,
    return
  }
  func.func @transform_0(%arg0: i32) -> (i32, i32) {
    %c0_i32 = arith.constant 0 : i32
    %c0_i32_0 = arith.constant 0 : i32
    return %arg0, %c0_i32 : i32, i32
  }
  func.func @transform_1(%arg0: i32) -> (i32, i32) {
    %c0_i32 = arith.constant 0 : i32
    %c0_i32_0 = arith.constant 0 : i32
    %c0_i32_1 = arith.constant 0 : i32
    return %c0_i32, %c0_i32_0 : i32, i32
  }
  func.func @transform_2(%arg0: i32) -> (i32, i32) {
    %c0_i32 = arith.constant 0 : i32
    %c0_i32_0 = arith.constant 0 : i32
    return %arg0, %c0_i32 : i32, i32
  }
}

module attributes {stable_mosaic.version = 11 : i64} {
  func.func @_mag_kernel(%arg0: i32, %arg1: memref<16x256xbf16, #tpu.memory_space<vmem>>, %arg2: memref<256x256xbf16, #tpu.memory_space<vmem>>, %arg3: memref<16x256xf32, #tpu.memory_space<vmem>>) attributes {dimension_semantics = [#tpu.dimension_semantics<parallel>], iteration_bounds = array<i64: 1>, scalar_prefetch = 0 : i64, scratch_operands = 0 : i64, tpu.core_type = #tpu.core_type<tc>, window_params = [{transform_indices = @transform_0, window_bounds = array<i64: 16, 256>}, {pipeline_mode = #tpu.pipeline_mode<synchronous>, transform_indices = @transform_1, window_bounds = array<i64: 256, 256>}, {transform_indices = @transform_2, window_bounds = array<i64: 16, 256>}]} {
    %c0 = arith.constant 0 : index
    %c0_0 = arith.constant 0 : index
    %0 = vector.load %arg1[%c0, %c0_0] : memref<16x256xbf16, #tpu.memory_space<vmem>>, vector<16x256xbf16>
    %c0_1 = arith.constant 0 : index
    %c0_2 = arith.constant 0 : index
    %1 = vector.load %arg2[%c0_1, %c0_2] : memref<256x256xbf16, #tpu.memory_space<vmem>>, vector<256x256xbf16>
    %cst = arith.constant dense<0.000000e+00> : vector<16x256xf32>
    %2 = tpu.matmul %0, %1, %cst {dimension_numbers = #tpu.dot_dimension_numbers<[1], [0], [0], [1], [0, 0, 1, 1], [], []>} : vector<16x256xbf16>, vector<256x256xbf16>, vector<16x256xf32> -> vector<16x256xf32>
    %3 = vector.extract_strided_slice %2 {offsets = [0, 0], sizes = [16, 128], strides = [1, 1]} : vector<16x256xf32> to vector<16x128xf32>
    %4 = vector.extract_strided_slice %2 {offsets = [0, 128], sizes = [16, 128], strides = [1, 1]} : vector<16x256xf32> to vector<16x128xf32>
    %5 = tpu.iota {dimensions = array<i32: 1>} : vector<1x128xi32>
    %c0_i32 = arith.constant 0 : i32
    %6 = vector.broadcast %c0_i32 : i32 to vector<1x128xi32>
    %7 = arith.cmpi eq, %5, %6 : vector<1x128xi32>
    %cst_3 = arith.constant 0.000000e+00 : f32
    %8 = vector.shape_cast %7 : vector<1x128xi1> to vector<1x128xi1>
    %9 = vector.broadcast %8 : vector<1x128xi1> to vector<16x128xi1>
    %10 = vector.broadcast %cst_3 : f32 to vector<16x128xf32>
    %11 = arith.select %9, %10, %4 : vector<16x128xi1>, vector<16x128xf32>
    %cst_4 = arith.constant 0.000000e+00 : f32
    %12 = vector.shape_cast %7 : vector<1x128xi1> to vector<1x128xi1>
    %13 = vector.broadcast %12 : vector<1x128xi1> to vector<16x128xi1>
    %14 = vector.broadcast %cst_4 : f32 to vector<16x128xf32>
    %15 = arith.select %13, %14, %3 : vector<16x128xi1>, vector<16x128xf32>
    %16 = arith.mulf %3, %3 : vector<16x128xf32>
    %17 = arith.mulf %11, %11 : vector<16x128xf32>
    %18 = arith.addf %16, %17 : vector<16x128xf32>
    %19 = math.sqrt %18 : vector<16x128xf32>
    %20 = arith.mulf %15, %15 : vector<16x128xf32>
    %21 = arith.mulf %4, %4 : vector<16x128xf32>
    %22 = arith.addf %20, %21 : vector<16x128xf32>
    %23 = math.sqrt %22 : vector<16x128xf32>
    %24 = tpu.concatenate %19, %23 in 1 : vector<16x128xf32>, vector<16x128xf32> -> vector<16x256xf32>
    %c0_5 = arith.constant 0 : index
    %c0_6 = arith.constant 0 : index
    %25 = vector.load %arg3[%c0_5, %c0_6] : memref<16x256xf32, #tpu.memory_space<vmem>>, vector<16x256xf32>
    tpu.vector_store %arg3[%c0_5, %c0_6], %24 {strides = array<i32>} : memref<16x256xf32, #tpu.memory_space<vmem>>, vector<16x256xf32>,
    return
  }
  func.func @transform_0(%arg0: i32) -> (i32, i32) {
    %c0_i32 = arith.constant 0 : i32
    %c0_i32_0 = arith.constant 0 : i32
    return %arg0, %c0_i32 : i32, i32
  }
  func.func @transform_1(%arg0: i32) -> (i32, i32) {
    %c0_i32 = arith.constant 0 : i32
    %c0_i32_0 = arith.constant 0 : i32
    %c0_i32_1 = arith.constant 0 : i32
    return %c0_i32, %c0_i32_0 : i32, i32
  }
  func.func @transform_2(%arg0: i32) -> (i32, i32) {
    %c0_i32 = arith.constant 0 : i32
    %c0_i32_0 = arith.constant 0 : i32
    return %arg0, %c0_i32 : i32, i32
  }
}

</mosaic_0001>

<bundles_post_ra>
// kernel: tpu_custom_call.1
= control target key start
LH: loop header
LB: loop body
LE: loop exit
PB: predicated region body
PF: predicated region fallthrough
CT: control target
= control target key end

     0   :  { %7 = vsyncpa [#allocation3], 0  ;;  %s591_s0 = inlined_call_operand.hbm [shape: bf16[16,256], index: 0, kind: input, shape index: {}]   ;;  %s592_s1 = inlined_call_operand.hbm [shape: bf16[256,256], index: 1, kind: input, shape index: {}]   ;;  %s593_s2 = inlined_call_operand.hbm [shape: f32[16,256], index: 2, kind: output, shape index: {}]  }
   0x1   :  { %8 = vsyncpa [#allocation6], 0 }
   0x2   :  { %9 = vsyncpa [#allocation4], 0  ;;  %s530_s9 = smov [#allocation2]   ;;  %s458_s13 = scalar_lea.hbm %s591_s0, 256 }
   0x3   :  { %s15_s10 = sshll.u32 %s530_s9, 4  ;;  %p459_p0 = scmp.ne.s32.totalorder %s591_s0, %s458_s13  ;;  %s16_s10 = int_to_ptr.vmem [resolvable:$true] %s15_s10 }
   0x4   :  { %p462_p1 = scmp.lt.u32.totalorder %s458_s13, %s591_s0 }
   0x6   :  { %p464_p2 = pnand %p462_p1, %p459_p0 }
   0x8   :  { %467 = shalt.err (!%p464_p2)
}
   0x9   :  { %s468_s18 = scalar_lea.vmem %s16_s10, 256  ;;  %p473_p4 = scmp.lt.s32.totalorder %s16_s10, %s16_s10 }
   0xa   :  { %p469_p3 = scmp.ne.s32.totalorder %s16_s10, %s468_s18  ;;  %p474_p5 = scmp.lt.s32.totalorder %s468_s18, %s468_s18 }
   0xc   :  { %p475_p6 = por %p474_p5, %p473_p4 }
   0xe   :  { %p476_p7 = pnand %p475_p6, %p469_p3 }
  0x10   :  { %479 = shalt.err (!%p476_p7)
}
  0x11   :  { %s531_s19 = smov 128   ;;  %s532_s20 = smov 8  }
  0x12   :  { %21 = dma.hbm_to_vmem [thread:$0]  %s591_s0, 256, %s16_s10, [#allocation3], %s531_s19, %s531_s19, %s532_s20  }
  0x13   :  { %s533_s23 = smov [#allocation5]   ;;  %s480_s27 = scalar_lea.hbm %s592_s1, 4096 }
  0x14   :  { %s27_s24 = sshll.u32 %s533_s23, 4  ;;  %p481_p8 = scmp.ne.s32.totalorder %s592_s1, %s480_s27  ;;  %s28_s24 = int_to_ptr.vmem [resolvable:$true] %s27_s24 }
  0x15   :  { %p484_p9 = scmp.lt.u32.totalorder %s480_s27, %s592_s1 }
  0x17   :  { %p486_p10 = pnand %p484_p9, %p481_p8 }
  0x19   :  { %489 = shalt.err (!%p486_p10)
}
  0x1a   :  { %s490_s4 = scalar_lea.vmem %s28_s24, 4096  ;;  %p495_p12 = scmp.lt.s32.totalorder %s28_s24, %s28_s24 }
  0x1b   :  { %p491_p11 = scmp.ne.s32.totalorder %s28_s24, %s490_s4  ;;  %p496_p13 = scmp.lt.s32.totalorder %s490_s4, %s490_s4 }
  0x1d   :  { %p497_p0 = por %p496_p13, %p495_p12 }
  0x1f   :  { %p498_p1 = pnand %p497_p0, %p491_p11 }
  0x21   :  { %501 = shalt.err (!%p498_p1)
}
  0x22   :  { %33 = dma.hbm_to_vmem [thread:$0]  %s592_s1, 4096, %s28_s24, [#allocation6], %s531_s19, %s531_s19, %s532_s20  }
  0x23   :  { %524 = dma.done.wait [#allocation3], 256  }
  0x24   :  { %525 = vsyncadd [#allocation3], 4294967040 }
  0x25   :  { %526 = dma.done.wait [#allocation6], 4096  }
  0x26   :  { %527 = vsyncadd [#allocation6], 4294963200  ;;  %v399_v0 = vld [vmem:[#allocation5 + $0x4] ss:$8 sps:$4 sm:$0xff]   ;;  %v401_v1 = vld [vmem:[#allocation5] ss:$8 sps:$4 sm:$0xff]   ;;  %v287_v34 = vlaneseq }
  0x27   :  { %244 = vmatprep.subr.bf16.mxu0 %v399_v0  ;;  %v402_v2 = vld [vmem:[#allocation5 + $0x14] ss:$8 sps:$4 sm:$0xff]   ;;  %v404_v3 = vld [vmem:[#allocation5 + $0x10] ss:$8 sps:$4 sm:$0xff]   ;;  %v405_v4 = vld [vmem:[#allocation5 + $0x24] ss:$8 sps:$4 sm:$0xff]  }
  0x28   :  { %245 = vmatpush1.bf16.msra.mxu0 %v401_v1  ;;  %v407_v5 = vld [vmem:[#allocation5 + $0x20] ss:$8 sps:$4 sm:$0xff]   ;;  %v408_v6 = vld [vmem:[#allocation5 + $0x34] ss:$8 sps:$4 sm:$0xff]   ;;  %v410_v7 = vld [vmem:[#allocation5 + $0x30] ss:$8 sps:$4 sm:$0xff]  }
  0x29   :  { %246 = vmatprep.subr.bf16.mxu0 %v402_v2  ;;  %v411_v8 = vld [vmem:[#allocation5 + $0x44] ss:$8 sps:$4 sm:$0xff]   ;;  %v413_v9 = vld [vmem:[#allocation5 + $0x40] ss:$8 sps:$4 sm:$0xff]   ;;  %v414_v10 = vld [vmem:[#allocation5 + $0x54] ss:$8 sps:$4 sm:$0xff]  }
  0x2a   :  { %v416_v11 = vld [vmem:[#allocation5 + $0x50] ss:$8 sps:$4 sm:$0xff]   ;;  %v417_v12 = vld [vmem:[#allocation5 + $0x64] ss:$8 sps:$4 sm:$0xff]   ;;  %v449_v13 = vld [vmem:[#allocation2 + $0x4] ss:$8 sps:$4 sm:$0xff]  }
  0x2b   :  { %v419_v14 = vld [vmem:[#allocation5 + $0x60] ss:$8 sps:$4 sm:$0xff]   ;;  %v420_v15 = vld [vmem:[#allocation5 + $0x74] ss:$8 sps:$4 sm:$0xff]   ;;  %276 = vmatprep.mubr.bf16.mxu0 %v449_v13  ;;  %v422_v16 = vld [vmem:[#allocation5 + $0x70] ss:$8 sps:$4 sm:$0xff]  }
  0x2c   :  { %247 = vmatpush1.bf16.msra.mxu0 %v404_v3  ;;  %v423_v17 = vld [vmem:[#allocation5 + $0x84] ss:$8 sps:$4 sm:$0xff]   ;;  %v425_v18 = vld [vmem:[#allocation5 + $0x80] ss:$8 sps:$4 sm:$0xff]   ;;  %v426_v19 = vld [vmem:[#allocation5 + $0x94] ss:$8 sps:$4 sm:$0xff]  }
  0x2d   :  { %248 = vmatprep.subr.bf16.mxu0 %v405_v4  ;;  %v428_v20 = vld [vmem:[#allocation5 + $0x90] ss:$8 sps:$4 sm:$0xff]   ;;  %v429_v21 = vld [vmem:[#allocation5 + $0xa4] ss:$8 sps:$4 sm:$0xff]   ;;  %v431_v22 = vld [vmem:[#allocation5 + $0xa0] ss:$8 sps:$4 sm:$0xff]  }
  0x2e   :  { %v432_v23 = vld [vmem:[#allocation5 + $0xb4] ss:$8 sps:$4 sm:$0xff]   ;;  %v434_v24 = vld [vmem:[#allocation5 + $0xb0] ss:$8 sps:$4 sm:$0xff]   ;;  %v435_v25 = vld [vmem:[#allocation5 + $0xc4] ss:$8 sps:$4 sm:$0xff]  }
  0x2f   :  { %v437_v26 = vld [vmem:[#allocation5 + $0xc0] ss:$8 sps:$4 sm:$0xff]   ;;  %v438_v27 = vld [vmem:[#allocation5 + $0xd4] ss:$8 sps:$4 sm:$0xff]   ;;  %v440_v28 = vld [vmem:[#allocation5 + $0xd0] ss:$8 sps:$4 sm:$0xff]  }
  0x30   :  { %249 = vmatpush1.bf16.msra.mxu0 %v407_v5  ;;  %v441_v29 = vld [vmem:[#allocation5 + $0xe4] ss:$8 sps:$4 sm:$0xff]   ;;  %v443_v30 = vld [vmem:[#allocation5 + $0xe0] ss:$8 sps:$4 sm:$0xff]   ;;  %v444_v31 = vld [vmem:[#allocation5 + $0xf4] ss:$8 sps:$4 sm:$0xff]  }
  0x31   :  { %250 = vmatprep.subr.bf16.mxu0 %v408_v6  ;;  %v446_v32 = vld [vmem:[#allocation5 + $0xf0] ss:$8 sps:$4 sm:$0xff]   ;;  %v288_v35 = vand.u32 127, %v287_v34  ;;  %s534_s1 = smov [#allocation7]  }
  0x32   :  { %v447_v33 = vld [vmem:[#allocation2] ss:$8 sps:$4 sm:$0xff]   ;;  %s345_s6 = sshll.u32 %s534_s1, 4  ;;  %s346_s6 = int_to_ptr.vmem [resolvable:$true] %s345_s6 }
  0x33   :  { %vm289_vm0 = vcmp.eq.s32.totalorder %v288_v35, 0  ;;  %s502_s7 = scalar_lea.vmem %s346_s6, 512  ;;  %p507_p3 = scmp.lt.s32.totalorder %s346_s6, %s346_s6 }
  0x34   :  { %251 = vmatpush1.bf16.msra.mxu0 %v410_v7  ;;  %p503_p2 = scmp.ne.s32.totalorder %s346_s6, %s502_s7  ;;  %p508_p4 = scmp.lt.s32.totalorder %s502_s7, %s502_s7 }
  0x35   :  { %252 = vmatprep.subr.bf16.mxu0 %v411_v8 }
  0x36   :  { %p509_p5 = por %p508_p4, %p507_p3 }
  0x38   :  { %253 = vmatpush1.bf16.msra.mxu0 %v413_v9  ;;  %p510_p6 = pnand %p509_p5, %p503_p2 }
  0x39   :  { %254 = vmatprep.subr.bf16.mxu0 %v414_v10 }
  0x3c   :  { %255 = vmatpush1.bf16.msra.mxu0 %v416_v11 }
  0x3d   :  { %256 = vmatprep.subr.bf16.mxu0 %v417_v12 }
  0x40   :  { %257 = vmatpush1.bf16.msra.mxu0 %v419_v14 }
  0x41   :  { %258 = vmatprep.subr.bf16.mxu0 %v420_v15 }
  0x44   :  { %259 = vmatpush1.bf16.msra.mxu0 %v422_v16 }
  0x45   :  { %260 = vmatprep.subr.bf16.mxu0 %v423_v17 }
  0x48   :  { %261 = vmatpush1.bf16.msra.mxu0 %v425_v18 }
  0x49   :  { %262 = vmatprep.subr.bf16.mxu0 %v426_v19 }
  0x4c   :  { %263 = vmatpush1.bf16.msra.mxu0 %v428_v20 }
  0x4d   :  { %264 = vmatprep.subr.bf16.mxu0 %v429_v21 }
  0x50   :  { %265 = vmatpush1.bf16.msra.mxu0 %v431_v22 }
  0x51   :  { %266 = vmatprep.subr.bf16.mxu0 %v432_v23 }
  0x54   :  { %267 = vmatpush1.bf16.msra.mxu0 %v434_v24 }
  0x55   :  { %268 = vmatprep.subr.bf16.mxu0 %v435_v25 }
  0x58   :  { %269 = vmatpush1.bf16.msra.mxu0 %v437_v26 }
  0x59   :  { %270 = vmatprep.subr.bf16.mxu0 %v438_v27 }
  0x5c   :  { %271 = vmatpush1.bf16.msra.mxu0 %v440_v28 }
  0x5d   :  { %272 = vmatprep.subr.bf16.mxu0 %v441_v29 }
  0x60   :  { %273 = vmatpush1.bf16.msra.mxu0 %v443_v30 }
  0x61   :  { %274 = vmatprep.subr.bf16.mxu0 %v444_v31 }
  0x64   :  { %275 = vmatpush1.bf16.msra.mxu0 %v446_v32 }
  0x67   :  { %277 = vmatmul.mubr.bf16.vlgmr.msra.gmra.mrb[0].mxu0 %v447_v33 }
 0x13a   :  { %v278_v36 = vpop.f32.mrb[0].mxu0 }
 0x13b   :  { %v294_v37 = vsel %vm289_vm0, 0.0, %v278_v36  ;;  %v280_v38 = vpop.f32.mrb[1].mxu0  ;;  %v296_v43 = vmul.f32 %v278_v36, %v278_v36 }
 0x13c   :  { %v316_v39 = vmul.f32 %v294_v37, %v294_v37  ;;  %v292_v40 = vsel %vm289_vm0, 0.0, %v280_v38  ;;  %v318_v41 = vmul.f32 %v280_v38, %v280_v38  ;;  %v282_v42 = vpop.f32.mrb[2].mxu0 }
 0x13d   :  { %v298_v44 = vmul.f32 %v292_v40, %v292_v40  ;;  %v295_v45 = vsel %vm289_vm0, 0.0, %v282_v42  ;;  %v284_v46 = vpop.f32.mrb[3].mxu0  ;;  %v297_v52 = vmul.f32 %v282_v42, %v282_v42 }
 0x13e   :  { %v320_v47 = vadd.f32 %v318_v41, %v316_v39  ;;  %v317_v48 = vmul.f32 %v295_v45, %v295_v45  ;;  %v293_v49 = vsel %vm289_vm0, 0.0, %v284_v46  ;;  %v319_v50 = vmul.f32 %v284_v46, %v284_v46 }
 0x13f   :  { %v300_v51 = vadd.f32 %v298_v44, %v296_v43  ;;  %v299_v53 = vmul.f32 %v293_v49, %v293_v49 }
 0x140   :  { %450 = vrsqrt.f32 %v320_v47  ;;  %v321_v54 = vadd.f32 %v319_v50, %v317_v48  ;;  %vm324_vm2 = vcmp.eq.f32.partialorder %v320_v47, inf  ;;  %vm326_vm3 = vcmp.eq.f32.partialorder %v320_v47, 0.0 }
 0x141   :  { %452 = vrsqrt.f32 %v300_v51  ;;  %v301_v55 = vadd.f32 %v299_v53, %v297_v52  ;;  %vm304_vm1 = vcmp.eq.f32.partialorder %v300_v51, inf  ;;  %vm306_vm5 = vcmp.eq.f32.partialorder %v300_v51, 0.0 }
 0x142   :  { %454 = vrsqrt.f32 %v321_v54  ;;  %vm331_vm4 = vcmp.eq.f32.partialorder %v321_v54, inf  ;;  %v327_v61 = vand.u32 2147483648, %v320_v47  ;;  %v334_v0 = vand.u32 2147483648, %v321_v54 }
 0x143   :  { %456 = vrsqrt.f32 %v301_v55  ;;  %v307_v1 = vand.u32 2147483648, %v300_v51  ;;  %vm311_vm6 = vcmp.eq.f32.partialorder %v301_v55, inf  ;;  %v314_v6 = vand.u32 2147483648, %v301_v55 }
 0x144   :  { %vm333_vm7 = vcmp.eq.f32.partialorder %v321_v54, 0.0  ;;  %vm313_vm8 = vcmp.eq.f32.partialorder %v301_v55, 0.0 }
 0x14a   :  { %v451_v56 = vpop.eup %450 }
 0x14b   :  { %v453_v57 = vpop.eup %452  ;;  %v323_v58 = vmul.f32 %v451_v56, %v320_v47 }
 0x14c   :  { %v455_v59 = vpop.eup %454  ;;  %v303_v60 = vmul.f32 %v453_v57, %v300_v51 }
 0x14d   :  { %v457_v62 = vpop.eup %456  ;;  %v330_v63 = vmul.f32 %v455_v59, %v321_v54  ;;  %v325_v2 = vsel %vm324_vm2, %v320_v47, %v323_v58 }
 0x14e   :  { %v310_v3 = vmul.f32 %v457_v62, %v301_v55  ;;  %v305_v4 = vsel %vm304_vm1, %v300_v51, %v303_v60  ;;  %v328_v5 = vsel %vm326_vm3, %v327_v61, %v325_v2 }
 0x14f   :  { %v308_v7 = vsel %vm306_vm5, %v307_v1, %v305_v4  ;;  %v332_v8 = vsel %vm331_vm4, %v321_v54, %v330_v63  ;;  %337 = vst [vmem:[#allocation7 + $0x8] sm:$0xff] %v328_v5 }
 0x150   :  { %v312_v9 = vsel %vm311_vm6, %v301_v55, %v310_v3  ;;  %v335_v10 = vsel %vm333_vm7, %v334_v0, %v332_v8  ;;  %336 = vst [vmem:[#allocation7] sm:$0xff] %v308_v7 }
 0x151   :  { %v315_v11 = vsel %vm313_vm8, %v314_v6, %v312_v9  ;;  %339 = vst [vmem:[#allocation7 + $0x18] sm:$0xff] %v335_v10 }
 0x152   :  { %338 = vst [vmem:[#allocation7 + $0x10] sm:$0xff] %v315_v11 }
 0x153   :  { %513 = shalt.err (!%p510_p6)
}
 0x154   :  { %s514_s10 = scalar_lea.hbm %s593_s2, 512 }
 0x155   :  { %p515_p7 = scmp.ne.s32.totalorder %s593_s2, %s514_s10  ;;  %p518_p8 = scmp.lt.u32.totalorder %s514_s10, %s593_s2 }
 0x157   :  { %p520_p9 = pnand %p518_p8, %p515_p7 }
 0x159   :  { %523 = shalt.err (!%p520_p9)
}
 0x15a   :  { %s535_s15 = smov 256   ;;  %s536_s16 = smov 16  }
 0x15b   :  { %351 = dma.vmem_to_hbm [thread:$0]  %s346_s6, 512, %s593_s2, [#allocation4], %s535_s15, %s535_s15, %s536_s16  }
 0x15c   :  { %528 = dma.done.wait [#allocation4], 512  }
 0x15d   :  { %529 = vsyncadd [#allocation4], 4294966784 }
 0x15e   :  { %355 = vsyncpa [#allocation3], 1 }
 0x15f   :  { %356 = vsyncpa [#allocation6], 1 }
 0x160   :  { %357 = vsyncpa [#allocation4], 1 }

// kernel: tpu_custom_call.1
= control target key start
LH: loop header
LB: loop body
LE: loop exit
PB: predicated region body
PF: predicated region fallthrough
CT: control target
= control target key end

     0   :  { %7 = vsyncpa [#allocation3], 0  ;;  %s591_s0 = inlined_call_operand.hbm [shape: bf16[16,256], index: 0, kind: input, shape index: {}]   ;;  %s592_s1 = inlined_call_operand.hbm [shape: bf16[256,256], index: 1, kind: input, shape index: {}]   ;;  %s593_s2 = inlined_call_operand.hbm [shape: f32[16,256], index: 2, kind: output, shape index: {}]  }
   0x1   :  { %8 = vsyncpa [#allocation6], 0 }
   0x2   :  { %9 = vsyncpa [#allocation4], 0  ;;  %s530_s9 = smov [#allocation2]   ;;  %s458_s13 = scalar_lea.hbm %s591_s0, 256 }
   0x3   :  { %s15_s10 = sshll.u32 %s530_s9, 4  ;;  %p459_p0 = scmp.ne.s32.totalorder %s591_s0, %s458_s13  ;;  %s16_s10 = int_to_ptr.vmem [resolvable:$true] %s15_s10 }
   0x4   :  { %p462_p1 = scmp.lt.u32.totalorder %s458_s13, %s591_s0 }
   0x6   :  { %p464_p2 = pnand %p462_p1, %p459_p0 }
   0x8   :  { %467 = shalt.err (!%p464_p2)
}
   0x9   :  { %s468_s18 = scalar_lea.vmem %s16_s10, 256  ;;  %p473_p4 = scmp.lt.s32.totalorder %s16_s10, %s16_s10 }
   0xa   :  { %p469_p3 = scmp.ne.s32.totalorder %s16_s10, %s468_s18  ;;  %p474_p5 = scmp.lt.s32.totalorder %s468_s18, %s468_s18 }
   0xc   :  { %p475_p6 = por %p474_p5, %p473_p4 }
   0xe   :  { %p476_p7 = pnand %p475_p6, %p469_p3 }
  0x10   :  { %479 = shalt.err (!%p476_p7)
}
  0x11   :  { %s531_s19 = smov 128   ;;  %s532_s20 = smov 8  }
  0x12   :  { %21 = dma.hbm_to_vmem [thread:$0]  %s591_s0, 256, %s16_s10, [#allocation3], %s531_s19, %s531_s19, %s532_s20  }
  0x13   :  { %s533_s23 = smov [#allocation5]   ;;  %s480_s27 = scalar_lea.hbm %s592_s1, 4096 }
  0x14   :  { %s27_s24 = sshll.u32 %s533_s23, 4  ;;  %p481_p8 = scmp.ne.s32.totalorder %s592_s1, %s480_s27  ;;  %s28_s24 = int_to_ptr.vmem [resolvable:$true] %s27_s24 }
  0x15   :  { %p484_p9 = scmp.lt.u32.totalorder %s480_s27, %s592_s1 }
  0x17   :  { %p486_p10 = pnand %p484_p9, %p481_p8 }
  0x19   :  { %489 = shalt.err (!%p486_p10)
}
  0x1a   :  { %s490_s4 = scalar_lea.vmem %s28_s24, 4096  ;;  %p495_p12 = scmp.lt.s32.totalorder %s28_s24, %s28_s24 }
  0x1b   :  { %p491_p11 = scmp.ne.s32.totalorder %s28_s24, %s490_s4  ;;  %p496_p13 = scmp.lt.s32.totalorder %s490_s4, %s490_s4 }
  0x1d   :  { %p497_p0 = por %p496_p13, %p495_p12 }
  0x1f   :  { %p498_p1 = pnand %p497_p0, %p491_p11 }
  0x21   :  { %501 = shalt.err (!%p498_p1)
}
  0x22   :  { %33 = dma.hbm_to_vmem [thread:$0]  %s592_s1, 4096, %s28_s24, [#allocation6], %s531_s19, %s531_s19, %s532_s20  }
  0x23   :  { %524 = dma.done.wait [#allocation3], 256  }
  0x24   :  { %525 = vsyncadd [#allocation3], 4294967040 }
  0x25   :  { %526 = dma.done.wait [#allocation6], 4096  }
  0x26   :  { %527 = vsyncadd [#allocation6], 4294963200  ;;  %v399_v0 = vld [vmem:[#allocation5 + $0x4] ss:$8 sps:$4 sm:$0xff]   ;;  %v401_v1 = vld [vmem:[#allocation5] ss:$8 sps:$4 sm:$0xff]   ;;  %v287_v34 = vlaneseq }
  0x27   :  { %244 = vmatprep.subr.bf16.mxu0 %v399_v0  ;;  %v402_v2 = vld [vmem:[#allocation5 + $0x14] ss:$8 sps:$4 sm:$0xff]   ;;  %v404_v3 = vld [vmem:[#allocation5 + $0x10] ss:$8 sps:$4 sm:$0xff]   ;;  %v405_v4 = vld [vmem:[#allocation5 + $0x24] ss:$8 sps:$4 sm:$0xff]  }
  0x28   :  { %245 = vmatpush1.bf16.msra.mxu0 %v401_v1  ;;  %v407_v5 = vld [vmem:[#allocation5 + $0x20] ss:$8 sps:$4 sm:$0xff]   ;;  %v408_v6 = vld [vmem:[#allocation5 + $0x34] ss:$8 sps:$4 sm:$0xff]   ;;  %v410_v7 = vld [vmem:[#allocation5 + $0x30] ss:$8 sps:$4 sm:$0xff]  }
  0x29   :  { %246 = vmatprep.subr.bf16.mxu0 %v402_v2  ;;  %v411_v8 = vld [vmem:[#allocation5 + $0x44] ss:$8 sps:$4 sm:$0xff]   ;;  %v413_v9 = vld [vmem:[#allocation5 + $0x40] ss:$8 sps:$4 sm:$0xff]   ;;  %v414_v10 = vld [vmem:[#allocation5 + $0x54] ss:$8 sps:$4 sm:$0xff]  }
  0x2a   :  { %v416_v11 = vld [vmem:[#allocation5 + $0x50] ss:$8 sps:$4 sm:$0xff]   ;;  %v417_v12 = vld [vmem:[#allocation5 + $0x64] ss:$8 sps:$4 sm:$0xff]   ;;  %v449_v13 = vld [vmem:[#allocation2 + $0x4] ss:$8 sps:$4 sm:$0xff]  }
  0x2b   :  { %v419_v14 = vld [vmem:[#allocation5 + $0x60] ss:$8 sps:$4 sm:$0xff]   ;;  %v420_v15 = vld [vmem:[#allocation5 + $0x74] ss:$8 sps:$4 sm:$0xff]   ;;  %276 = vmatprep.mubr.bf16.mxu0 %v449_v13  ;;  %v422_v16 = vld [vmem:[#allocation5 + $0x70] ss:$8 sps:$4 sm:$0xff]  }
  0x2c   :  { %247 = vmatpush1.bf16.msra.mxu0 %v404_v3  ;;  %v423_v17 = vld [vmem:[#allocation5 + $0x84] ss:$8 sps:$4 sm:$0xff]   ;;  %v425_v18 = vld [vmem:[#allocation5 + $0x80] ss:$8 sps:$4 sm:$0xff]   ;;  %v426_v19 = vld [vmem:[#allocation5 + $0x94] ss:$8 sps:$4 sm:$0xff]  }
  0x2d   :  { %248 = vmatprep.subr.bf16.mxu0 %v405_v4  ;;  %v428_v20 = vld [vmem:[#allocation5 + $0x90] ss:$8 sps:$4 sm:$0xff]   ;;  %v429_v21 = vld [vmem:[#allocation5 + $0xa4] ss:$8 sps:$4 sm:$0xff]   ;;  %v431_v22 = vld [vmem:[#allocation5 + $0xa0] ss:$8 sps:$4 sm:$0xff]  }
  0x2e   :  { %v432_v23 = vld [vmem:[#allocation5 + $0xb4] ss:$8 sps:$4 sm:$0xff]   ;;  %v434_v24 = vld [vmem:[#allocation5 + $0xb0] ss:$8 sps:$4 sm:$0xff]   ;;  %v435_v25 = vld [vmem:[#allocation5 + $0xc4] ss:$8 sps:$4 sm:$0xff]  }
  0x2f   :  { %v437_v26 = vld [vmem:[#allocation5 + $0xc0] ss:$8 sps:$4 sm:$0xff]   ;;  %v438_v27 = vld [vmem:[#allocation5 + $0xd4] ss:$8 sps:$4 sm:$0xff]   ;;  %v440_v28 = vld [vmem:[#allocation5 + $0xd0] ss:$8 sps:$4 sm:$0xff]  }
  0x30   :  { %249 = vmatpush1.bf16.msra.mxu0 %v407_v5  ;;  %v441_v29 = vld [vmem:[#allocation5 + $0xe4] ss:$8 sps:$4 sm:$0xff]   ;;  %v443_v30 = vld [vmem:[#allocation5 + $0xe0] ss:$8 sps:$4 sm:$0xff]   ;;  %v444_v31 = vld [vmem:[#allocation5 + $0xf4] ss:$8 sps:$4 sm:$0xff]  }
  0x31   :  { %250 = vmatprep.subr.bf16.mxu0 %v408_v6  ;;  %v446_v32 = vld [vmem:[#allocation5 + $0xf0] ss:$8 sps:$4 sm:$0xff]   ;;  %v288_v35 = vand.u32 127, %v287_v34  ;;  %s534_s1 = smov [#allocation7]  }
  0x32   :  { %v447_v33 = vld [vmem:[#allocation2] ss:$8 sps:$4 sm:$0xff]   ;;  %s345_s6 = sshll.u32 %s534_s1, 4  ;;  %s346_s6 = int_to_ptr.vmem [resolvable:$true] %s345_s6 }
  0x33   :  { %vm289_vm0 = vcmp.eq.s32.totalorder %v288_v35, 0  ;;  %s502_s7 = scalar_lea.vmem %s346_s6, 512  ;;  %p507_p3 = scmp.lt.s32.totalorder %s346_s6, %s346_s6 }
  0x34   :  { %251 = vmatpush1.bf16.msra.mxu0 %v410_v7  ;;  %p503_p2 = scmp.ne.s32.totalorder %s346_s6, %s502_s7  ;;  %p508_p4 = scmp.lt.s32.totalorder %s502_s7, %s502_s7 }
  0x35   :  { %252 = vmatprep.subr.bf16.mxu0 %v411_v8 }
  0x36   :  { %p509_p5 = por %p508_p4, %p507_p3 }
  0x38   :  { %253 = vmatpush1.bf16.msra.mxu0 %v413_v9  ;;  %p510_p6 = pnand %p509_p5, %p503_p2 }
  0x39   :  { %254 = vmatprep.subr.bf16.mxu0 %v414_v10 }
  0x3c   :  { %255 = vmatpush1.bf16.msra.mxu0 %v416_v11 }
  0x3d   :  { %256 = vmatprep.subr.bf16.mxu0 %v417_v12 }
  0x40   :  { %257 = vmatpush1.bf16.msra.mxu0 %v419_v14 }
  0x41   :  { %258 = vmatprep.subr.bf16.mxu0 %v420_v15 }
  0x44   :  { %259 = vmatpush1.bf16.msra.mxu0 %v422_v16 }
  0x45   :  { %260 = vmatprep.subr.bf16.mxu0 %v423_v17 }
  0x48   :  { %261 = vmatpush1.bf16.msra.mxu0 %v425_v18 }
  0x49   :  { %262 = vmatprep.subr.bf16.mxu0 %v426_v19 }
  0x4c   :  { %263 = vmatpush1.bf16.msra.mxu0 %v428_v20 }
  0x4d   :  { %264 = vmatprep.subr.bf16.mxu0 %v429_v21 }
  0x50   :  { %265 = vmatpush1.bf16.msra.mxu0 %v431_v22 }
  0x51   :  { %266 = vmatprep.subr.bf16.mxu0 %v432_v23 }
  0x54   :  { %267 = vmatpush1.bf16.msra.mxu0 %v434_v24 }
  0x55   :  { %268 = vmatprep.subr.bf16.mxu0 %v435_v25 }
  0x58   :  { %269 = vmatpush1.bf16.msra.mxu0 %v437_v26 }
  0x59   :  { %270 = vmatprep.subr.bf16.mxu0 %v438_v27 }
  0x5c   :  { %271 = vmatpush1.bf16.msra.mxu0 %v440_v28 }
  0x5d   :  { %272 = vmatprep.subr.bf16.mxu0 %v441_v29 }
  0x60   :  { %273 = vmatpush1.bf16.msra.mxu0 %v443_v30 }
  0x61   :  { %274 = vmatprep.subr.bf16.mxu0 %v444_v31 }
  0x64   :  { %275 = vmatpush1.bf16.msra.mxu0 %v446_v32 }
  0x67   :  { %277 = vmatmul.mubr.bf16.vlgmr.msra.gmra.mrb[0].mxu0 %v447_v33 }
 0x13a   :  { %v278_v36 = vpop.f32.mrb[0].mxu0 }
 0x13b   :  { %v294_v37 = vsel %vm289_vm0, 0.0, %v278_v36  ;;  %v280_v38 = vpop.f32.mrb[1].mxu0  ;;  %v296_v43 = vmul.f32 %v278_v36, %v278_v36 }
 0x13c   :  { %v316_v39 = vmul.f32 %v294_v37, %v294_v37  ;;  %v292_v40 = vsel %vm289_vm0, 0.0, %v280_v38  ;;  %v318_v41 = vmul.f32 %v280_v38, %v280_v38  ;;  %v282_v42 = vpop.f32.mrb[2].mxu0 }
 0x13d   :  { %v298_v44 = vmul.f32 %v292_v40, %v292_v40  ;;  %v295_v45 = vsel %vm289_vm0, 0.0, %v282_v42  ;;  %v284_v46 = vpop.f32.mrb[3].mxu0  ;;  %v297_v52 = vmul.f32 %v282_v42, %v282_v42 }
 0x13e   :  { %v320_v47 = vadd.f32 %v318_v41, %v316_v39  ;;  %v317_v48 = vmul.f32 %v295_v45, %v295_v45  ;;  %v293_v49 = vsel %vm289_vm0, 0.0, %v284_v46  ;;  %v319_v50 = vmul.f32 %v284_v46, %v284_v46 }
 0x13f   :  { %v300_v51 = vadd.f32 %v298_v44, %v296_v43  ;;  %v299_v53 = vmul.f32 %v293_v49, %v293_v49 }
 0x140   :  { %450 = vrsqrt.f32 %v320_v47  ;;  %v321_v54 = vadd.f32 %v319_v50, %v317_v48  ;;  %vm324_vm2 = vcmp.eq.f32.partialorder %v320_v47, inf  ;;  %vm326_vm3 = vcmp.eq.f32.partialorder %v320_v47, 0.0 }
 0x141   :  { %452 = vrsqrt.f32 %v300_v51  ;;  %v301_v55 = vadd.f32 %v299_v53, %v297_v52  ;;  %vm304_vm1 = vcmp.eq.f32.partialorder %v300_v51, inf  ;;  %vm306_vm5 = vcmp.eq.f32.partialorder %v300_v51, 0.0 }
 0x142   :  { %454 = vrsqrt.f32 %v321_v54  ;;  %vm331_vm4 = vcmp.eq.f32.partialorder %v321_v54, inf  ;;  %v327_v61 = vand.u32 2147483648, %v320_v47  ;;  %v334_v0 = vand.u32 2147483648, %v321_v54 }
 0x143   :  { %456 = vrsqrt.f32 %v301_v55  ;;  %v307_v1 = vand.u32 2147483648, %v300_v51  ;;  %vm311_vm6 = vcmp.eq.f32.partialorder %v301_v55, inf  ;;  %v314_v6 = vand.u32 2147483648, %v301_v55 }
 0x144   :  { %vm333_vm7 = vcmp.eq.f32.partialorder %v321_v54, 0.0  ;;  %vm313_vm8 = vcmp.eq.f32.partialorder %v301_v55, 0.0 }
 0x14a   :  { %v451_v56 = vpop.eup %450 }
 0x14b   :  { %v453_v57 = vpop.eup %452  ;;  %v323_v58 = vmul.f32 %v451_v56, %v320_v47 }
 0x14c   :  { %v455_v59 = vpop.eup %454  ;;  %v303_v60 = vmul.f32 %v453_v57, %v300_v51 }
 0x14d   :  { %v457_v62 = vpop.eup %456  ;;  %v330_v63 = vmul.f32 %v455_v59, %v321_v54  ;;  %v325_v2 = vsel %vm324_vm2, %v320_v47, %v323_v58 }
 0x14e   :  { %v310_v3 = vmul.f32 %v457_v62, %v301_v55  ;;  %v305_v4 = vsel %vm304_vm1, %v300_v51, %v303_v60  ;;  %v328_v5 = vsel %vm326_vm3, %v327_v61, %v325_v2 }
 0x14f   :  { %v308_v7 = vsel %vm306_vm5, %v307_v1, %v305_v4  ;;  %v332_v8 = vsel %vm331_vm4, %v321_v54, %v330_v63  ;;  %337 = vst [vmem:[#allocation7 + $0x8] sm:$0xff] %v328_v5 }
 0x150   :  { %v312_v9 = vsel %vm311_vm6, %v301_v55, %v310_v3  ;;  %v335_v10 = vsel %vm333_vm7, %v334_v0, %v332_v8  ;;  %336 = vst [vmem:[#allocation7] sm:$0xff] %v308_v7 }
 0x151   :  { %v315_v11 = vsel %vm313_vm8, %v314_v6, %v312_v9  ;;  %339 = vst [vmem:[#allocation7 + $0x18] sm:$0xff] %v335_v10 }
 0x152   :  { %338 = vst [vmem:[#allocation7 + $0x10] sm:$0xff] %v315_v11 }
 0x153   :  { %513 = shalt.err (!%p510_p6)
}
 0x154   :  { %s514_s10 = scalar_lea.hbm %s593_s2, 512 }
 0x155   :  { %p515_p7 = scmp.ne.s32.totalorder %s593_s2, %s514_s10  ;;  %p518_p8 = scmp.lt.u32.totalorder %s514_s10, %s593_s2 }
 0x157   :  { %p520_p9 = pnand %p518_p8, %p515_p7 }
 0x159   :  { %523 = shalt.err (!%p520_p9)
}
 0x15a   :  { %s535_s15 = smov 256   ;;  %s536_s16 = smov 16  }
 0x15b   :  { %351 = dma.vmem_to_hbm [thread:$0]  %s346_s6, 512, %s593_s2, [#allocation4], %s535_s15, %s535_s15, %s536_s16  }
 0x15c   :  { %528 = dma.done.wait [#allocation4], 512  }
 0x15d   :  { %529 = vsyncadd [#allocation4], 4294966784 }
 0x15e   :  { %355 = vsyncpa [#allocation3], 1 }
 0x15f   :  { %356 = vsyncpa [#allocation6], 1 }
 0x160   :  { %357 = vsyncpa [#allocation4], 1 }

</bundles_post_ra>
